<compile_context>
chip_gen: v7x
topology: tpu7x:2x2x1
jax: 0.10.0
libtpu: 0.0.40
codegen_flags: <defaults>
</compile_context>

<pallas_src>
import functools

import jax
import jax.numpy as jnp
from jax import lax
from jax.experimental import pallas as pl
from jax.experimental.pallas import tpu as pltpu


def _dynamic_filter_kernel(x_ref, coef_ref, o_ref, *, width, compute_dtype):
    """One (batch, channel-tile) step of the dynamic_filter forward.

    x_ref:    (1, CBLK, H*W)   input slab, spatial plane flattened into lanes
    coef_ref: (1, CBLK, 10)    per-channel constants:
              cols 0..7 = folded off-centre taps in (dy, dx) row-major order
                          [(-1,-1),(-1,0),(-1,+1),(0,-1),(0,+1),(+1,-1),(+1,0),(+1,+1)]
              col  8    = D = centre tap' + lamb_h + 1
              col  9    = B = inside_all * lamb_l * GAP
    o_ref:    (1, CBLK, H*W)
    """
    x = x_ref[0].astype(compute_dtype)            # (Cb, HW)
    coef = coef_ref[0].astype(compute_dtype)      # (Cb, 10)
    hw = x.shape[-1]
    w = width

    # Boundary masks for the flattened plane (hoisted out of the tap terms).
    pos = lax.broadcasted_iota(jnp.int32, (1, hw), 1)
    col = pos % w
    w_first = col == 0
    w_last = col == (w - 1)
    h_first = pos < w
    h_last = pos >= (hw - w)

    def cc(j):                                    # per-channel scalar -> (Cb, 1)
        return coef[:, j:j + 1]

    def rroll(v, s):                              # circular roll right: y[p] = v[p-s]
        return pltpu.roll(v, s, axis=1)

    # Centre tap + epilogue are folded into D and B (host-side).
    acc = x * cc(8) - cc(9)

    # Lane-axis (W) neighbours with 1-px reflection (reflect -1 -> 1, W -> W-2).
    x_r1 = rroll(x, 1)                            # x[h, w-1] (circular)
    x_l1 = rroll(x, hw - 1)                       # x[h, w+1] (circular)
    acc = acc + cc(3) * jnp.where(w_first, x_l1, x_r1)   # left  neighbour
    acc = acc + cc(4) * jnp.where(w_last, x_r1, x_l1)    # right neighbour

    # Row-axis (H) neighbours: rows are `w` lanes apart in the flattened plane.
    x_rw = rroll(x, w)                            # x[h-1, w] (circular)
    x_lw = rroll(x, hw - w)                       # x[h+1, w] (circular)
    up = jnp.where(h_first, x_lw, x_rw)           # x[refl(h-1), w]
    dn = jnp.where(h_last, x_rw, x_lw)            # x[refl(h+1), w]
    acc = acc + cc(1) * up + cc(6) * dn

    # Corner taps: shift the already row-reflected slabs along W (separable).
    up_r1 = rroll(up, 1)
    up_l1 = rroll(up, hw - 1)
    acc = acc + cc(0) * jnp.where(w_first, up_l1, up_r1)
    acc = acc + cc(2) * jnp.where(w_last, up_r1, up_l1)

    dn_r1 = rroll(dn, 1)
    dn_l1 = rroll(dn, hw - 1)
    acc = acc + cc(5) * jnp.where(w_first, dn_l1, dn_r1)
    acc = acc + cc(7) * jnp.where(w_last, dn_r1, dn_l1)

    o_ref[0] = acc.astype(o_ref.dtype)


def _pick_channel_block(C, HW, in_itemsize, cmp_itemsize, *, n_batch,
                        vmem_budget_bytes=28 << 20,
                        target_slab_bytes=2 << 20,
                        min_grid_steps=4):
    """VMEM-budget-aware channel block: double-buffered I/O + ~6 live temps + coef."""

    def vmem_cost(cb):
        io = cb * HW * in_itemsize                # one input / one output slab
        tmp = cb * HW * cmp_itemsize              # one compute-dtype temporary
        coef = cb * 128 * 4                       # lane-padded coef tile
        return 4 * io + 6 * tmp + 2 * coef        # 2x in + 2x out + temps + 2x coef

    # BlockSpec second-minor dim must be a multiple of 8 or the full extent.
    cands = sorted(d for d in range(1, C + 1)
                   if C % d == 0 and (d % 8 == 0 or d == C))
    fitting = [d for d in cands
               if vmem_cost(d) <= vmem_budget_bytes
               and d * HW * in_itemsize <= target_slab_bytes]
    if not fitting:
        # TODO(synk): add an H-tiled (halo) fallback for very large spatial planes.
        return cands[0]
    preferred = [d for d in fitting if n_batch * (C // d) >= min_grid_steps]
    return max(preferred) if preferred else max(fitting)


def dynamic_filter_forward(x, params, *, kernel_size=3, group=8, dilation=1):
    """x: (N, C, H, W) float32/bfloat16 (NCHW, like the PyTorch module)."""
    N, C, H, W = x.shape
    if kernel_size != 3 or dilation != 1:
        # TODO(synk): only the module defaults (kernel_size=3, dilation=1) are
        # implemented; MSM also instantiates dilation in {7, 9, 11}.
        raise NotImplementedError("only kernel_size=3, dilation=1 supported")
    assert C % group == 0, "channels must be divisible by group"
    assert H >= 2 and W >= 2, "reflection padding needs H >= 2 and W >= 2"
    k2 = kernel_size * kernel_size
    HW = H * W

    compute_dtype = jnp.bfloat16 if x.dtype == jnp.bfloat16 else jnp.float32

    # ---- tiny glue: filter-generation head on (N, C); pooled doubles as GAP ----
    pooled = jnp.mean(x.astype(jnp.float32), axis=(2, 3))     # AdaptiveAvgPool2d((1,1))
    lf = pooled @ params["conv_w"].T                           # 1x1 conv, no bias
    lf = (lf - params["bn_mean"]) * lax.rsqrt(params["bn_var"] + 1e-5)
    lf = lf * params["bn_gamma"] + params["bn_beta"]           # BatchNorm2d (eval mode)
    lf = jnp.tanh(lf).reshape(N, group, k2)                    # (N, group, 9)
    filt = jnp.repeat(lf, C // group, axis=1)                  # (N, C, 9)

    # ---- host-side folding of the per-channel epilogue constants ----
    a = ((params["inside_all"] + 1.0) * params["lamb_l"])[None, :, None]   # (1, C, 1)
    taps = filt * a                                            # (N, C, 9) folded taps
    d_coef = taps[:, :, 4] + (params["lamb_h"] + 1.0)[None, :]             # centre + lamb_h + 1
    b_coef = (params["inside_all"] * params["lamb_l"])[None, :] * pooled   # inside*lamb_l*GAP
    off_centre = [0, 1, 2, 3, 5, 6, 7, 8]
    coef = jnp.concatenate(
        [taps[:, :, off_centre], d_coef[:, :, None], b_coef[:, :, None]],
        axis=-1).astype(compute_dtype)                         # (N, C, 10)
    K = coef.shape[-1]

    x_flat = x.reshape(N, C, HW)                               # free metadata reshape

    in_itemsize = jnp.dtype(x.dtype).itemsize
    cmp_itemsize = jnp.dtype(compute_dtype).itemsize
    cblk = _pick_channel_block(C, HW, in_itemsize, cmp_itemsize, n_batch=N)
    grid = (N, C // cblk)

    flops = 26 * N * C * HW
    bytes_accessed = 2 * N * C * HW * in_itemsize + int(coef.size) * cmp_itemsize
    kern = functools.partial(_dynamic_filter_kernel, width=W,
                             compute_dtype=compute_dtype)

    out_flat = pl.pallas_call(
        kern,
        out_shape=jax.ShapeDtypeStruct((N, C, HW), x.dtype),
        grid=grid,
        in_specs=[
            pl.BlockSpec((1, cblk, HW), lambda n, cb: (n, cb, 0)),
            pl.BlockSpec((1, cblk, K), lambda n, cb: (n, cb, 0)),
        ],
        out_specs=pl.BlockSpec((1, cblk, HW), lambda n, cb: (n, cb, 0)),
        compiler_params=pltpu.CompilerParams(
            dimension_semantics=("parallel", "parallel"),
            vmem_limit_bytes=40 * 1024 * 1024,   # headroom on v7x's 64 MiB VMEM
        ),
        cost_estimate=pl.CostEstimate(
            flops=flops, transcendentals=0, bytes_accessed=int(bytes_accessed)),
    )(x_flat, coef)
    return out_flat.reshape(N, C, H, W)


def reference_forward(x, params, *, kernel_size=3, group=8):
    """Pure-JAX reference mirroring the PyTorch forward (for validation)."""
    N, C, H, W = x.shape
    k2 = kernel_size * kernel_size
    pad = (kernel_size - 1) // 2
    pooled = jnp.mean(x, axis=(2, 3))
    lf = pooled @ params["conv_w"].T
    lf = (lf - params["bn_mean"]) / jnp.sqrt(params["bn_var"] + 1e-5)
    lf = lf * params["bn_gamma"] + params["bn_beta"]
    lf = jnp.tanh(lf).reshape(N, group, 1, k2, 1)
    x_pad = jnp.pad(x, ((0, 0), (0, 0), (pad, pad), (pad, pad)), mode="reflect")
    patches = []
    for dy in range(kernel_size):
        for dx in range(kernel_size):
            patches.append(x_pad[:, :, dy:dy + H, dx:dx + W])
    unf = jnp.stack(patches, axis=2).reshape(N, group, C // group, k2, H * W)
    low_part = jnp.sum(unf * lf, axis=3).reshape(N, C, H, W)
    gap = jnp.mean(x, axis=(2, 3), keepdims=True)
    inside = params["inside_all"][None, :, None, None]
    out_low = (low_part * (inside + 1.0) - inside * gap)
    out_low = out_low * params["lamb_l"][None, :, None, None]
    out_high = x * (params["lamb_h"][None, :, None, None] + 1.0)
    return out_low + out_high


if __name__ == "__main__":
    N, C, H, W = 2, 16, 16, 16
    group, ksize = 8, 3
    k2 = ksize * ksize

    key = jax.random.PRNGKey(0)
    ks = jax.random.split(key, 6)
    x = jax.random.normal(ks[0], (N, C, H, W), jnp.float32)

    fan_out = group * k2 * 1 * 1  # kaiming_normal_(mode='fan_out', relu)
    params = {
        "conv_w": jax.random.normal(ks[1], (group * k2, C), jnp.float32)
                  * jnp.sqrt(2.0 / fan_out),
        "bn_gamma": jnp.ones((group * k2,), jnp.float32),
        "bn_beta": jnp.zeros((group * k2,), jnp.float32),
        "bn_mean": jnp.zeros((group * k2,), jnp.float32),
        "bn_var": jnp.ones((group * k2,), jnp.float32),
        # torch initializes these to zero (which makes the module an identity
        # map); use small deterministic random values so the kernel path is
        # actually exercised.
        "lamb_l": 0.1 * jax.random.normal(ks[2], (C,), jnp.float32),
        "lamb_h": 0.1 * jax.random.normal(ks[3], (C,), jnp.float32),
        "inside_all": 0.1 * jax.random.normal(ks[4], (C,), jnp.float32),
    }

    out = dynamic_filter_forward(x, params, kernel_size=ksize, group=group)
    out = jax.block_until_ready(out)

    ref = reference_forward(x, params, kernel_size=ksize, group=group)
    assert out.shape == (N, C, H, W)
    max_err = float(jnp.max(jnp.abs(out - ref)))
    assert jnp.allclose(out, ref, atol=1e-4, rtol=1e-4), max_err
    print("KERNEL_OK")
</pallas_src>

<mosaic_0001>
module attributes {stable_mosaic.version = 11 : i64} {
  func.func @_dynamic_filter_kernel(%arg0: i32, %arg1: i32, %arg2: memref<1x8x256xf32, #tpu.memory_space<vmem>>, %arg3: memref<1x8x10xf32, #tpu.memory_space<vmem>>, %arg4: memref<1x8x256xf32, #tpu.memory_space<vmem>>) attributes {dimension_semantics = [#tpu.dimension_semantics<parallel>, #tpu.dimension_semantics<parallel>], iteration_bounds = array<i64: 2, 2>, scalar_prefetch = 0 : i64, scratch_operands = 0 : i64, tpu.core_type = #tpu.core_type<tc>, window_params = [{transform_indices = @transform_0, window_bounds = array<i64: 1, 8, 256>}, {transform_indices = @transform_1, window_bounds = array<i64: 1, 8, 10>}, {transform_indices = @transform_2, window_bounds = array<i64: 1, 8, 256>}]} {
    %c0 = arith.constant 0 : index
    %c0_0 = arith.constant 0 : index
    %c0_1 = arith.constant 0 : index
    %0 = vector.load %arg2[%c0, %c0_0, %c0_1] : memref<1x8x256xf32, #tpu.memory_space<vmem>>, vector<1x8x256xf32>
    %1 = vector.shape_cast %0 : vector<1x8x256xf32> to vector<8x256xf32>
    %c0_2 = arith.constant 0 : index
    %c0_3 = arith.constant 0 : index
    %c0_4 = arith.constant 0 : index
    %2 = vector.load %arg3[%c0_2, %c0_3, %c0_4] : memref<1x8x10xf32, #tpu.memory_space<vmem>>, vector<1x8x10xf32>
    %3 = vector.shape_cast %2 : vector<1x8x10xf32> to vector<8x10xf32>
    %4 = tpu.iota {dimensions = array<i32: 1>} : vector<1x256xi32>
    %c16_i32 = arith.constant 16 : i32
    %c0_i32 = arith.constant 0 : i32
    %5 = arith.cmpi eq, %c16_i32, %c0_i32 : i32
    %c1_i32 = arith.constant 1 : i32
    %6 = arith.select %5, %c1_i32, %c16_i32 : i32
    %7 = vector.broadcast %6 : i32 to vector<1x256xi32>
    %8 = arith.remsi %4, %7 : vector<1x256xi32>
    %c0_i32_5 = arith.constant 0 : i32
    %9 = vector.broadcast %c0_i32_5 : i32 to vector<1x256xi32>
    %10 = arith.cmpi ne, %8, %9 : vector<1x256xi32>
    %c0_i32_6 = arith.constant 0 : i32
    %11 = vector.broadcast %c0_i32_6 : i32 to vector<1x256xi32>
    %12 = arith.cmpi slt, %8, %11 : vector<1x256xi32>
    %c0_i32_7 = arith.constant 0 : i32
    %13 = arith.cmpi slt, %6, %c0_i32_7 : i32
    %14 = vector.broadcast %13 : i1 to vector<1x256xi1>
    %15 = vector.broadcast %14 : vector<1x256xi1> to vector<1x256xi1>
    %16 = arith.xori %12, %15 : vector<1x256xi1>
    %17 = arith.andi %16, %10 : vector<1x256xi1>
    %18 = vector.broadcast %6 : i32 to vector<1x256xi32>
    %19 = arith.addi %8, %18 : vector<1x256xi32>
    %20 = arith.select %17, %19, %8 : vector<1x256xi1>, vector<1x256xi32>
    %c0_i32_8 = arith.constant 0 : i32
    %21 = vector.broadcast %c0_i32_8 : i32 to vector<1x256xi32>
    %22 = arith.cmpi eq, %20, %21 : vector<1x256xi32>
    %c15_i32 = arith.constant 15 : i32
    %23 = vector.broadcast %c15_i32 : i32 to vector<1x256xi32>
    %24 = arith.cmpi eq, %20, %23 : vector<1x256xi32>
    %c16_i32_9 = arith.constant 16 : i32
    %25 = vector.broadcast %c16_i32_9 : i32 to vector<1x256xi32>
    %26 = arith.cmpi slt, %4, %25 : vector<1x256xi32>
    %c240_i32 = arith.constant 240 : i32
    %27 = vector.broadcast %c240_i32 : i32 to vector<1x256xi32>
    %28 = arith.cmpi sge, %4, %27 : vector<1x256xi32>
    %29 = vector.extract_strided_slice %3 {offsets = [0, 8], sizes = [8, 1], strides = [1, 1]} : vector<8x10xf32> to vector<8x1xf32>
    %30 = vector.broadcast %29 : vector<8x1xf32> to vector<8x256xf32>
    %31 = arith.mulf %1, %30 : vector<8x256xf32>
    %32 = vector.extract_strided_slice %3 {offsets = [0, 9], sizes = [8, 1], strides = [1, 1]} : vector<8x10xf32> to vector<8x1xf32>
    %33 = vector.broadcast %32 : vector<8x1xf32> to vector<8x256xf32>
    %34 = arith.subf %31, %33 : vector<8x256xf32>
    %c1_i32_10 = arith.constant 1 : i32
    %35 = tpu.dynamic_rotate %1 by %c1_i32_10 dim 1 : vector<8x256xf32>, i32 -> vector<8x256xf32>
    %c255_i32 = arith.constant 255 : i32
    %36 = tpu.dynamic_rotate %1 by %c255_i32 dim 1 : vector<8x256xf32>, i32 -> vector<8x256xf32>
    %37 = vector.extract_strided_slice %3 {offsets = [0, 3], sizes = [8, 1], strides = [1, 1]} : vector<8x10xf32> to vector<8x1xf32>
    %38 = vector.shape_cast %22 : vector<1x256xi1> to vector<1x256xi1>
    %39 = vector.broadcast %38 : vector<1x256xi1> to vector<8x256xi1>
    %40 = arith.select %39, %36, %35 : vector<8x256xi1>, vector<8x256xf32>
    %41 = vector.broadcast %37 : vector<8x1xf32> to vector<8x256xf32>
    %42 = arith.mulf %41, %40 : vector<8x256xf32>
    %43 = arith.addf %34, %42 : vector<8x256xf32>
    %44 = vector.extract_strided_slice %3 {offsets = [0, 4], sizes = [8, 1], strides = [1, 1]} : vector<8x10xf32> to vector<8x1xf32>
    %45 = vector.shape_cast %24 : vector<1x256xi1> to vector<1x256xi1>
    %46 = vector.broadcast %45 : vector<1x256xi1> to vector<8x256xi1>
    %47 = arith.select %46, %35, %36 : vector<8x256xi1>, vector<8x256xf32>
    %48 = vector.broadcast %44 : vector<8x1xf32> to vector<8x256xf32>
    %49 = arith.mulf %48, %47 : vector<8x256xf32>
    %50 = arith.addf %43, %49 : vector<8x256xf32>
    %c16_i32_11 = arith.constant 16 : i32
    %51 = tpu.dynamic_rotate %1 by %c16_i32_11 dim 1 : vector<8x256xf32>, i32 -> vector<8x256xf32>
    %c240_i32_12 = arith.constant 240 : i32
    %52 = tpu.dynamic_rotate %1 by %c240_i32_12 dim 1 : vector<8x256xf32>, i32 -> vector<8x256xf32>
    %53 = vector.shape_cast %26 : vector<1x256xi1> to vector<1x256xi1>
    %54 = vector.broadcast %53 : vector<1x256xi1> to vector<8x256xi1>
    %55 = arith.select %54, %52, %51 : vector<8x256xi1>, vector<8x256xf32>
    %56 = vector.shape_cast %28 : vector<1x256xi1> to vector<1x256xi1>
    %57 = vector.broadcast %56 : vector<1x256xi1> to vector<8x256xi1>
    %58 = arith.select %57, %51, %52 : vector<8x256xi1>, vector<8x256xf32>
    %59 = vector.extract_strided_slice %3 {offsets = [0, 1], sizes = [8, 1], strides = [1, 1]} : vector<8x10xf32> to vector<8x1xf32>
    %60 = vector.broadcast %59 : vector<8x1xf32> to vector<8x256xf32>
    %61 = arith.mulf %60, %55 : vector<8x256xf32>
    %62 = arith.addf %50, %61 : vector<8x256xf32>
    %63 = vector.extract_strided_slice %3 {offsets = [0, 6], sizes = [8, 1], strides = [1, 1]} : vector<8x10xf32> to vector<8x1xf32>
    %64 = vector.broadcast %63 : vector<8x1xf32> to vector<8x256xf32>
    %65 = arith.mulf %64, %58 : vector<8x256xf32>
    %66 = arith.addf %62, %65 : vector<8x256xf32>
    %c1_i32_13 = arith.constant 1 : i32
    %67 = tpu.dynamic_rotate %55 by %c1_i32_13 dim 1 : vector<8x256xf32>, i32 -> vector<8x256xf32>
    %c255_i32_14 = arith.constant 255 : i32
    %68 = tpu.dynamic_rotate %55 by %c255_i32_14 dim 1 : vector<8x256xf32>, i32 -> vector<8x256xf32>
    %69 = vector.extract_strided_slice %3 {offsets = [0, 0], sizes = [8, 1], strides = [1, 1]} : vector<8x10xf32> to vector<8x1xf32>
    %70 = vector.shape_cast %22 : vector<1x256xi1> to vector<1x256xi1>
    %71 = vector.broadcast %70 : vector<1x256xi1> to vector<8x256xi1>
    %72 = arith.select %71, %68, %67 : vector<8x256xi1>, vector<8x256xf32>
    %73 = vector.broadcast %69 : vector<8x1xf32> to vector<8x256xf32>
    %74 = arith.mulf %73, %72 : vector<8x256xf32>
    %75 = arith.addf %66, %74 : vector<8x256xf32>
    %76 = vector.extract_strided_slice %3 {offsets = [0, 2], sizes = [8, 1], strides = [1, 1]} : vector<8x10xf32> to vector<8x1xf32>
    %77 = vector.shape_cast %24 : vector<1x256xi1> to vector<1x256xi1>
    %78 = vector.broadcast %77 : vector<1x256xi1> to vector<8x256xi1>
    %79 = arith.select %78, %67, %68 : vector<8x256xi1>, vector<8x256xf32>
    %80 = vector.broadcast %76 : vector<8x1xf32> to vector<8x256xf32>
    %81 = arith.mulf %80, %79 : vector<8x256xf32>
    %82 = arith.addf %75, %81 : vector<8x256xf32>
    %c1_i32_15 = arith.constant 1 : i32
    %83 = tpu.dynamic_rotate %58 by %c1_i32_15 dim 1 : vector<8x256xf32>, i32 -> vector<8x256xf32>
    %c255_i32_16 = arith.constant 255 : i32
    %84 = tpu.dynamic_rotate %58 by %c255_i32_16 dim 1 : vector<8x256xf32>, i32 -> vector<8x256xf32>
    %85 = vector.extract_strided_slice %3 {offsets = [0, 5], sizes = [8, 1], strides = [1, 1]} : vector<8x10xf32> to vector<8x1xf32>
    %86 = vector.shape_cast %22 : vector<1x256xi1> to vector<1x256xi1>
    %87 = vector.broadcast %86 : vector<1x256xi1> to vector<8x256xi1>
    %88 = arith.select %87, %84, %83 : vector<8x256xi1>, vector<8x256xf32>
    %89 = vector.broadcast %85 : vector<8x1xf32> to vector<8x256xf32>
    %90 = arith.mulf %89, %88 : vector<8x256xf32>
    %91 = arith.addf %82, %90 : vector<8x256xf32>
    %92 = vector.extract_strided_slice %3 {offsets = [0, 7], sizes = [8, 1], strides = [1, 1]} : vector<8x10xf32> to vector<8x1xf32>
    %93 = vector.shape_cast %24 : vector<1x256xi1> to vector<1x256xi1>
    %94 = vector.broadcast %93 : vector<1x256xi1> to vector<8x256xi1>
    %95 = arith.select %94, %83, %84 : vector<8x256xi1>, vector<8x256xf32>
    %96 = vector.broadcast %92 : vector<8x1xf32> to vector<8x256xf32>
    %97 = arith.mulf %96, %95 : vector<8x256xf32>
    %98 = arith.addf %91, %97 : vector<8x256xf32>
    %c0_17 = arith.constant 0 : index
    %c0_18 = arith.constant 0 : index
    %c0_19 = arith.constant 0 : index
    %99 = vector.load %arg4[%c0_17, %c0_18, %c0_19] : memref<1x8x256xf32, #tpu.memory_space<vmem>>, vector<1x8x256xf32>
    %100 = vector.shape_cast %99 : vector<1x8x256xf32> to vector<8x256xf32>
    %101 = vector.shape_cast %98 : vector<8x256xf32> to vector<1x8x256xf32>
    tpu.vector_store %arg4[%c0_17, %c0_18, %c0_19], %101 {strides = array<i32>} : memref<1x8x256xf32, #tpu.memory_space<vmem>>, vector<1x8x256xf32>,
    return
  }
  func.func @transform_0(%arg0: i32, %arg1: i32) -> (i32, i32, i32) {
    %c0_i32 = arith.constant 0 : i32
    %c0_i32_0 = arith.constant 0 : i32
    return %arg0, %arg1, %c0_i32 : i32, i32, i32
  }
  func.func @transform_1(%arg0: i32, %arg1: i32) -> (i32, i32, i32) {
    %c0_i32 = arith.constant 0 : i32
    %c0_i32_0 = arith.constant 0 : i32
    return %arg0, %arg1, %c0_i32 : i32, i32, i32
  }
  func.func @transform_2(%arg0: i32, %arg1: i32) -> (i32, i32, i32) {
    %c0_i32 = arith.constant 0 : i32
    %c0_i32_0 = arith.constant 0 : i32
    return %arg0, %arg1, %c0_i32 : i32, i32, i32
  }
}

</mosaic_0001>

<bundles_post_ra>
// kernel: tpu_custom_call.1
= control target key start
LH: loop header
LB: loop body
LE: loop exit
PB: predicated region body
PF: predicated region fallthrough
CT: control target
= control target key end

     0   :  { %7 = vsyncpa [#allocation3], 0  ;;  %s1116_s0 = inlined_call_operand.hbm [shape: f32[2,16,256], index: 0, kind: input, shape index: {}]   ;;  %s1117_s1 = inlined_call_operand.vmem [shape: f32[2,16,10], index: 1, kind: input, shape index: {}]   ;;  %s1118_s2 = inlined_call_operand.hbm [shape: f32[2,16,256], index: 2, kind: output, shape index: {}]  }
   0x1   :  { %9 = vsyncpa [#allocation3 + $0x1], 0 }
   0x2   :  { %10 = vsyncpa [#allocation4], 0 }
   0x3   :  { %12 = vsyncpa [#allocation4 + $0x1], 0  ;;  %s813_s9 = smov 0   ;;  %s815_s10 = smov 0  }
   0x4   :  { %s817_s11 = smov 0   ;;  %s819_s12 = smov 0  }
   0x5   :  { %s821_s13 = smov 0   ;;  %s823_s14 = smov 0  }
   0x6   :  { %s825_s15 = smov 0   ;;  %s827_s16 = smov 0  }
   0x7 LB: > { %s531_s17 = sadd.s32 4294967295, %s780_s16   ;;  %s532_s18 = sadd.s32 4294967294, %s780_s16   ;;  %s780_s16 = sphi %s827_s16, %s18_s16   ;;  %s776_s15 = sphi %s825_s15, %s1143_s15   ;;  %s772_s14 = sphi %s823_s14, %s1142_s14   ;;  %s768_s13 = sphi %s821_s13, %s1141_s13   ;;  %s764_s12 = sphi %s819_s12, %s1140_s12   ;;  %s760_s11 = sphi %s817_s11, %s1139_s11   ;;  %s756_s10 = sphi %s815_s10, %s1138_s10   ;;  %s752_s9 = sphi %s813_s9, %s1137_s9  }
   0x8   : > { %s27_s19 = sadd.s32 1, %s772_s14  ;;  %s30_s20 = sadd.s32 1, %s776_s15 }
   0x9   : > { %p28_p0 = scmp.ge.s32.totalorder %s27_s19, 2  ;;  %s39_s21 = sadd.s32 1, %s760_s11 }
   0xa   : > { %p46_p1 = scmp.ne.s32.totalorder %s760_s11, %s756_s10  ;;  %p47_p2 = scmp.eq.s32.totalorder %s780_s16, 0 }
   0xb   : > { %s1145_s19 = smov (%p28_p0, %s27_s19), 0  ;;  %s1147_s20 = smov (!%p28_p0, %s30_s20), %s776_s15 }
   0xc   : > { %s35_s22 = ssub.s32 %s772_s14, %s1145_s19  ;;  %p866_p3 = por %p47_p2, %p46_p1 }
   0xd   : > { %p32_p4 = scmp.ge.s32.totalorder %s1147_s20, 2  ;;  %p52_p5 = scmp.ne.s32.totalorder %s756_s10, %s752_s9 }
   0xe   : > { %p53_p6 = scmp.eq.s32.totalorder %s531_s17, 0  ;;  %p106_p7 = scmp.eq.s32.totalorder %s531_s17, 3 }
   0xf   : > { %s1149_s20 = smov (%p32_p4, %s1147_s20), 0  ;;  %p112_p10 = scmp.eq.s32.totalorder %s532_s18, 3 }
  0x10   : > { %p874_p8 = por %p53_p6, %p52_p5  ;;  %p878_p9 = por %p106_p7, %p46_p1 }
  0x11   : > { %s34_s26 = ssub.s32 %s776_s15, %s1149_s20  ;;  %p884_p12 = por %p112_p10, %p52_p5 }
  0x12   : > { %s1122_s25 = scalar_select %p878_p9, 1, 0 }
  0x13   : > { %s36_s27 = sor.u32 %s35_s22, %s34_s26  ;;  %p562_p13 = scmp.lt.s32.totalorder %s780_s16, 4 }
  0x14   : > { %p37_p11 = scmp.eq.s32.totalorder %s36_s27, 0  ;;  %s132_s29 = sand.u32 1, %s760_s11  }
  0x15   : > { %s1123_s28 = scalar_select %p884_p12, 1, 0 }
  0x16   : > { %s891_s30 = scalar_select %p37_p11, %s760_s11, %s39_s21  }
  0x17   : > { %s535_s3 = sshll.u32 %s132_s29, 4  ;;  %s536_s4 = sshll.u32 %s772_s14, 1 }
  0x18   : > { %s537_s5 = sshll.u32 %s776_s15, 2  ;;  %s136_s6 = scalar_lea.vmem [#allocation2], %s535_s3 }
  0x19   : > { %s146_s7 = sshll.u32 %s136_s6, 4  ;;  %s142_s8 = sadd.s32 %s537_s5, %s536_s4  ;;  %s895_s7 = int_to_ptr.vmem [resolvable:$true] %s146_s7 }
  0x1a   : > { %s538_s17 = sshll.u32 %s142_s8, 7  ;;  %p899_p0 = pnand %p562_p13, %p866_p3 }
  0x1b   : > { %s906_s21 = scalar_lea.hbm %s1116_s0, %s538_s17  ;;  %s133_s27 = scalar_lea.sflag [#allocation3], %s132_s29 }
  0x1c   : > { %s652_s3 = scalar_lea.hbm %s906_s21, 256  ;;  %p654_p3 = pneg %p899_p0 }
  0x1d   : > { %p653_p4 = scmp.ne.s32.totalorder %s906_s21, %s652_s3  ;;  %s657_s5 = scalar_lea.hbm %s1116_s0, 1024 }
  0x1e   : > { %p658_p7 = scmp.lt.u32.totalorder %s906_s21, %s1116_s0  ;;  %p659_p10 = scmp.lt.u32.totalorder %s657_s5, %s652_s3 }
  0x1f   : > { %p655_p5 = pnand %p654_p3, %p653_p4  ;;  %p661_p13 = scmp.lt.u32.totalorder %s652_s3, %s906_s21 }
  0x20   : > { %p660_p11 = por %p659_p10, %p658_p7 }
  0x21   : > { %p656_p6 = pneg %p655_p5 }
  0x22   : > { %p662_p1 = por %p661_p13, %p660_p11 }
  0x24   : > { %p663_p2 = pnand %p662_p1, %p656_p6 }
  0x26   : > { %666 = shalt.err (!%p663_p2)
}
  0x27   : > { %s667_s29 = scalar_lea.vmem %s895_s7, 256  ;;  %s782_s17 = smov [#allocation2]  }
  0x28   : > { %p668_p4 = scmp.ne.s32.totalorder %s895_s7, %s667_s29  ;;  %s672_s22 = sshll.u32 %s782_s17, 4  ;;  %s673_s22 = int_to_ptr.vmem [resolvable:$false] %s672_s22 }
  0x29   : > { %s674_s26 = scalar_lea.vmem %s673_s22, 512  ;;  %p675_p9 = scmp.lt.s32.totalorder %s895_s7, %s673_s22 }
  0x2a   : > { %p670_p5 = pnand %p668_p4, %p654_p3  ;;  %p676_p7 = scmp.lt.s32.totalorder %s674_s26, %s667_s29 }
  0x2c   : > { %p671_p12 = pneg %p670_p5  ;;  %p677_p10 = por %p676_p7, %p675_p9 }
  0x2e   : > { %p678_p11 = pnand %p677_p10, %p671_p12 }
  0x30   : > { %681 = shalt.err (!%p678_p11)
}
  0x31   : > { %557 = dma.hbm_to_vmem [thread:$0]  (!%p899_p0), %s906_s21, 256, %s895_s7, %s133_s27  }
  0x32   : > { %p1125_p1 = scmp.lt.s32.totalorder %s780_s16, 5  ;;  %p1126_p2 = scmp.ge.s32.totalorder %s780_s16, 1 }
  0x34   : > { %p163_p3 = pnand %p1126_p2, %p1125_p1 }
  0x35   : > { %s940_s3 = sand.u32 (!%p163_p3), 1, %s756_s10  }
  0x36   : > { %166 = sbr.rel (%p163_p3) target bundleno = 337 (0x151), region = 28  ;;  %s540_s23 = sshll.u32 (!%p163_p3), %s940_s3, 4 }
  0x37   : > { %s169_s4 = scalar_lea.sflag (!%p163_p3), [#allocation3], %s940_s3  ;;  %s172_s18 = scalar_lea.vmem (!%p163_p3), [#allocation2], %s540_s23 }
  0x3d   : > { %743 = dma.done.wait (%p874_p8), %s169_s4, 256  }
  0x3e   : > { %745 = vsyncadd (%p874_p8), %s169_s4, 4294967040  ;;  %v783_v0 = vmov 9   ;;  %p201_p9 = scmp.lt.s32.totalorder %s768_s13, 1  ;;  %p203_p12 = scmp.lt.s32.totalorder %s764_s12, 1  ;;  %v784_v1 = vmov 8   ;;  %v954_v2 = vld [vmem:[%s172_s18] sm:$0xff]  ;;  %v212_v13 = vlaneseq }
  0x3f   : > { %643 = vset.pattern.permute.xlu1 %v783_v0  ;;  %642 = vset.pattern.permute.xlu0 %v784_v1  ;;  %s785_s8 = smov 112   ;;  %s786_s24 = smov 16   ;;  %v958_v3 = vld [vmem:[%s172_s18 + $0x8] sm:$0xff]  ;;  %v787_v5 = vmov 3   ;;  %v788_v6 = vmov 4   ;;  %v789_v7 = vmov 1  }
  0x40   : > { %s202_s7 = scalar_select %p201_p9, %s768_s13, 1  ;;  %308 = vrot.lane.b32.xlu1 %v954_v2, %s785_s8  ;;  %302 = vrot.lane.b32.xlu0 %v954_v2, %s786_s24  ;;  %v791_v8 = vmov 0   ;;  %v793_v9 = vmov 6   ;;  %v794_v10 = vmov 7   ;;  %v795_v11 = vmov 2  }
  0x41   : > { %s204_s21 = scalar_select %p203_p12, %s764_s12, 1  ;;  %v796_v12 = vmov 5   ;;  %v973_v14 = vand.u32 127, %v212_v13 }
  0x42   : > { %s542_s27 = sshll.u32 %s202_s7, 1  ;;  %s790_s26 = smov 1  }
  0x43   : > { %s206_s5 = sadd.s32 %s542_s27, %s204_s21  ;;  %s792_s4 = smov 127   ;;  %vm312_vm0 = vcmp.lt.s32.totalorder %v973_v14, 112  ;;  %vm243_vm1 = vcmp.lt.s32.totalorder %v973_v14, 16  ;;  %v214_v23 = vadd.s32 128, %v973_v14  ;;  %v219_v33 = vand.u32 15, %v973_v14 }
  0x44   : > { %s543_s6 = sshll.u32 %s206_s5, 3  ;;  %310 = vrot.lane.b32.xlu1 %v958_v3, %s785_s8  ;;  %304 = vrot.lane.b32.xlu0 %v958_v3, %s786_s24  ;;  %vm264_vm3 = vcmp.lt.s32.totalorder %v973_v14, 1  ;;  %vm271_vm6 = vcmp.lt.s32.totalorder %v973_v14, 127  ;;  %s545_s18 = sshll.u32 %s764_s12, 1 }
  0x45   : > { %s208_s22 = scalar_lea.vmem %s1117_s1, %s543_s6  ;;  %vm246_vm2 = vcmp.ge.s32.totalorder %v214_v23, 240  ;;  %v226_v32 = vand.u32 15, %v214_v23  ;;  %vm1003_vm7 = vcmp.eq.s32.totalorder %v219_v33, 0  ;;  %vm1007_vm8 = vcmp.eq.s32.totalorder %v219_v33, 15  ;;  %s546_s7 = sshll.u32 %s768_s13, 2 }
  0x46   : > { %v211_v4 = vld [vmem:[%s208_s22] sm:$0xff]  ;;  %s422_s21 = sadd.s32 %s546_s7, %s545_s18  ;;  %s200_s13 = scalar_lea.vmem [#allocation5], %s540_s23 }
  0x47   : > { %vm990_vm4 = vcmp.eq.s32.totalorder %v226_v32, 0  ;;  %vm994_vm5 = vcmp.eq.s32.totalorder %v226_v32, 15  ;;  %s547_s12 = sshll.u32 %s422_s21, 7  ;;  %s426_s27 = sshll.u32 %s200_s13, 4  ;;  %s1064_s27 = int_to_ptr.vmem [resolvable:$true] %s426_s27 }
  0x48   : > { %255 = vperm.xlu1 %643, %v211_v4   ;;  %249 = vperm.xlu0 %642, %v211_v4   ;;  %s1062_s8 = scalar_lea.hbm %s1118_s2, %s547_s12  ;;  %s410_s23 = scalar_lea.sflag [#allocation4], %s940_s3 }
  0x49   : > { %s682_s24 = scalar_lea.vmem %s1064_s27, 256  ;;  %p1135_p0 = scmp.ne.s32.totalorder %s1122_s25, 0 }
  0x4a   : > { %p683_p8 = scmp.ne.s32.totalorder %s1064_s27, %s682_s24  ;;  %s797_s29 = smov [#allocation5]  }
  0x4b   : > { %s686_s17 = sshll.u32 %s797_s29, 4  ;;  %s687_s17 = int_to_ptr.vmem [resolvable:$false] %s686_s17 }
  0x4c   : > { %644 = vset.pattern.permute.xlu1 %v787_v5  ;;  %645 = vset.pattern.permute.xlu0 %v788_v6  ;;  %p684_p6 = pnand %p683_p8, %p1135_p0  ;;  %s688_s22 = scalar_lea.vmem %s687_s17, 512 }
  0x4d   : > { %281 = vperm.xlu1 %644, %v211_v4   ;;  %295 = vperm.xlu0 %645, %v211_v4   ;;  %p689_p4 = scmp.lt.s32.totalorder %s1064_s27, %s687_s17  ;;  %p690_p5 = scmp.lt.s32.totalorder %s688_s22, %s682_s24 }
  0x4e   : > { %p685_p13 = pneg %p684_p6 }
  0x4f   : > { %p691_p7 = por %p690_p5, %p689_p4 }
  0x51   : > { %646 = vset.pattern.permute.xlu1 %v789_v7  ;;  %262 = vrot.lane.b32.xlu0 %v958_v3, %s790_s26  ;;  %p692_p10 = pnand %p691_p7, %p685_p13 }
  0x52   : > { %328 = vperm.xlu1 %646, %v211_v4   ;;  %648 = vset.pattern.permute.xlu0 %v791_v8 }
  0x55   : > { %269 = vrot.lane.b32.xlu0 %v958_v3, %s792_s4 }
  0x56   : > { %260 = vrot.lane.b32.xlu1 %v954_v2, %s790_s26 }
  0x57   : > { %647 = vset.pattern.permute.xlu1 %v793_v9 }
  0x59   : > { %358 = vperm.xlu0 %648, %v211_v4  }
  0x5a   : > { %267 = vrot.lane.b32.xlu1 %v954_v2, %s792_s4 }
  0x5d   : > { %651 = vset.pattern.permute.xlu0 %v794_v10 }
  0x5e   : > { %336 = vperm.xlu1 %647, %v211_v4   ;;  %400 = vperm.xlu0 %651, %v211_v4  }
  0x62   : > { %649 = vset.pattern.permute.xlu1 %v795_v11 }
  0x63   : > { %368 = vperm.xlu1 %649, %v211_v4  }
  0x67   : > { %650 = vset.pattern.permute.xlu1 %v796_v12 }
  0x68   : > { %390 = vperm.xlu1 %650, %v211_v4  }
  0xb2   : > { %v309_v15 = vpop.permute.xlu1 %308  ;;  %v303_v16 = vpop.permute.xlu0 %302 }
  0xb6   : > { %v311_v17 = vpop.permute.xlu1 %310  ;;  %v305_v18 = vpop.permute.xlu0 %304 }
  0xb7   : > { %v313_v19 = vsel %vm312_vm0, %v309_v15, %v311_v17  ;;  %v306_v20 = vsel %vm243_vm1, %v303_v16, %v305_v18  ;;  %v307_v21 = vsel %vm243_vm1, %v305_v18, %v303_v16  ;;  %v314_v24 = vsel %vm312_vm0, %v311_v17, %v309_v15 }
  0xb8   : > { %345 = vrot.lane.b32.xlu1 %v306_v20, %s790_s26  ;;  %v319_v22 = vsel %vm243_vm1, %v313_v19, %v307_v21  ;;  %v326_v25 = vsel %vm246_vm2, %v306_v20, %v314_v24 }
  0xb9   : > { %343 = vrot.lane.b32.xlu0 %v319_v22, %s790_s26 }
  0xbc   : > { %351 = vrot.lane.b32.xlu1 %v306_v20, %s792_s4 }
  0xbd   : > { %349 = vrot.lane.b32.xlu0 %v319_v22, %s792_s4 }
  0xc0   : > { %375 = vrot.lane.b32.xlu1 %v313_v19, %s790_s26 }
  0xc1   : > { %381 = vrot.lane.b32.xlu0 %v313_v19, %s792_s4 }
  0xc4   : > { %377 = vrot.lane.b32.xlu1 %v326_v25, %s790_s26 }
  0xc7   : > { %v256_v26 = vpop.permute.xlu1 %255  ;;  %v250_v27 = vpop.permute.xlu0 %249 }
  0xc8   : > { %383 = vrot.lane.b32.xlu1 %v326_v25, %s792_s4  ;;  %v252_v35 = vmul.f32 %v250_v27, %v954_v2  ;;  %v253_v36 = vmul.f32 %v250_v27, %v958_v3 }
  0xca   : > { %v258_v45 = vsub.f32 %v252_v35, %v256_v26  ;;  %v259_v46 = vsub.f32 %v253_v36, %v256_v26 }
  0xcc   : > { %v282_v28 = vpop.permute.xlu1 %281  ;;  %v296_v29 = vpop.permute.xlu0 %295 }
  0xd0   : > { %v263_v31 = vpop.permute.xlu0 %262 }
  0xd1   : > { %v329_v30 = vpop.permute.xlu1 %328 }
  0xd2   : > { %v331_v60 = vmul.f32 %v329_v30, %v319_v22  ;;  %v332_v61 = vmul.f32 %v329_v30, %v306_v20 }
  0xd4   : > { %v270_v39 = vpop.permute.xlu0 %269 }
  0xd5   : > { %v261_v34 = vpop.permute.xlu1 %260 }
  0xd6   : > { %v265_v40 = vsel %vm264_vm3, %v261_v34, %v263_v31  ;;  %v266_v41 = vsel %vm264_vm3, %v263_v31, %v261_v34 }
  0xd8   : > { %v359_v7 = vpop.permute.xlu0 %358 }
  0xd9   : > { %v268_v44 = vpop.permute.xlu1 %267 }
  0xda   : > { %v272_v47 = vsel %vm271_vm6, %v268_v44, %v270_v39  ;;  %v273_v48 = vsel %vm271_vm6, %v270_v39, %v268_v44 }
  0xdb   : > { %v278_v49 = vsel %vm1003_vm7, %v272_v47, %v266_v41  ;;  %v279_v50 = vsel %vm990_vm4, %v273_v48, %v265_v40  ;;  %v292_v51 = vsel %vm1007_vm8, %v266_v41, %v272_v47  ;;  %v293_v52 = vsel %vm994_vm5, %v265_v40, %v273_v48 }
  0xdc   : > { %v284_v53 = vmul.f32 %v282_v28, %v278_v49  ;;  %v285_v54 = vmul.f32 %v282_v28, %v279_v50  ;;  %v298_v55 = vmul.f32 %v296_v29, %v292_v51  ;;  %v299_v56 = vmul.f32 %v296_v29, %v293_v52 }
  0xdd   : > { %v337_v59 = vpop.permute.xlu1 %336  ;;  %v401_v9 = vpop.permute.xlu0 %400 }
  0xde   : > { %v286_v57 = vadd.f32 %v284_v53, %v258_v45  ;;  %v287_v58 = vadd.f32 %v285_v54, %v259_v46  ;;  %v339_v2 = vmul.f32 %v337_v59, %v313_v19  ;;  %v340_v3 = vmul.f32 %v337_v59, %v326_v25 }
  0xe0   : > { %v300_v62 = vadd.f32 %v298_v55, %v286_v57  ;;  %v301_v63 = vadd.f32 %v299_v56, %v287_v58 }
  0xe2   : > { %v333_v0 = vadd.f32 %v331_v60, %v300_v62  ;;  %v334_v1 = vadd.f32 %v332_v61, %v301_v63  ;;  %v369_v6 = vpop.permute.xlu1 %368 }
  0xe4   : > { %v341_v4 = vadd.f32 %v339_v2, %v333_v0  ;;  %v342_v5 = vadd.f32 %v340_v3, %v334_v1 }
  0xe7   : > { %v391_v8 = vpop.permute.xlu1 %390 }
 0x12a   : > { %v346_v10 = vpop.permute.xlu1 %345 }
 0x12b   : > { %v344_v11 = vpop.permute.xlu0 %343 }
 0x12c   : > { %v347_v15 = vsel %vm264_vm3, %v344_v11, %v346_v10  ;;  %v348_v16 = vsel %vm264_vm3, %v346_v10, %v344_v11 }
 0x12e   : > { %v352_v12 = vpop.permute.xlu1 %351 }
 0x12f   : > { %v350_v13 = vpop.permute.xlu0 %349 }
 0x130   : > { %v353_v17 = vsel %vm271_vm6, %v350_v13, %v352_v12  ;;  %v354_v18 = vsel %vm271_vm6, %v352_v12, %v350_v13 }
 0x131   : > { %v355_v19 = vsel %vm1003_vm7, %v353_v17, %v348_v16  ;;  %v356_v20 = vsel %vm990_vm4, %v354_v18, %v347_v15  ;;  %v365_v21 = vsel %vm1007_vm8, %v348_v16, %v353_v17  ;;  %v366_v22 = vsel %vm994_vm5, %v347_v15, %v354_v18 }
 0x132   : > { %v361_v23 = vmul.f32 %v359_v7, %v355_v19  ;;  %v362_v24 = vmul.f32 %v359_v7, %v356_v20  ;;  %v376_v25 = vpop.permute.xlu1 %375  ;;  %v371_v28 = vmul.f32 %v369_v6, %v365_v21  ;;  %v372_v29 = vmul.f32 %v369_v6, %v366_v22 }
 0x133   : > { %v382_v33 = vpop.permute.xlu0 %381 }
 0x134   : > { %v363_v26 = vadd.f32 %v361_v23, %v341_v4  ;;  %v364_v27 = vadd.f32 %v362_v24, %v342_v5 }
 0x136   : > { %v373_v30 = vadd.f32 %v371_v28, %v363_v26  ;;  %v374_v31 = vadd.f32 %v372_v29, %v364_v27  ;;  %v378_v32 = vpop.permute.xlu1 %377 }
 0x137   : > { %v379_v35 = vsel %vm264_vm3, %v376_v25, %v378_v32  ;;  %v380_v36 = vsel %vm264_vm3, %v378_v32, %v376_v25 }
 0x13a   : > { %v384_v34 = vpop.permute.xlu1 %383 }
 0x13b   : > { %v385_v39 = vsel %vm271_vm6, %v382_v33, %v384_v34  ;;  %v386_v40 = vsel %vm271_vm6, %v384_v34, %v382_v33 }
 0x13c   : > { %v387_v41 = vsel %vm1003_vm7, %v385_v39, %v380_v36  ;;  %v388_v44 = vsel %vm990_vm4, %v386_v40, %v379_v35  ;;  %v397_v45 = vsel %vm1007_vm8, %v380_v36, %v385_v39  ;;  %v398_v46 = vsel %vm994_vm5, %v379_v35, %v386_v40 }
 0x13d   : > { %v393_v47 = vmul.f32 %v391_v8, %v387_v41  ;;  %v394_v48 = vmul.f32 %v391_v8, %v388_v44  ;;  %v403_v49 = vmul.f32 %v401_v9, %v397_v45  ;;  %v404_v50 = vmul.f32 %v401_v9, %v398_v46 }
 0x13f   : > { %v395_v14 = vadd.f32 %v393_v47, %v373_v30  ;;  %v396_v42 = vadd.f32 %v394_v48, %v374_v31 }
 0x141   : > { %v405_v37 = vadd.f32 %v403_v49, %v395_v14  ;;  %v406_v51 = vadd.f32 %v404_v50, %v396_v42 }
 0x143   : > { %407 = vst [vmem:[%s200_s13] sm:$0xff] %v405_v37  ;;  %408 = vst [vmem:[%s200_s13 + $0x8] sm:$0xff] %v406_v51 }
 0x144   : > { %695 = shalt.err (!%p692_p10)
}
 0x145   : > { %s696_s3 = scalar_lea.hbm %s1062_s8, 256  ;;  %s700_s18 = scalar_lea.hbm %s1118_s2, 1024 }
 0x146   : > { %p697_p11 = scmp.ne.s32.totalorder %s1062_s8, %s696_s3  ;;  %p701_p3 = scmp.lt.u32.totalorder %s1062_s8, %s1118_s2 }
 0x147   : > { %p702_p9 = scmp.lt.u32.totalorder %s700_s18, %s696_s3  ;;  %p704_p8 = scmp.lt.u32.totalorder %s696_s3, %s1062_s8 }
 0x148   : > { %p698_p1 = pnand %p697_p11, %p1135_p0 }
 0x149   : > { %p703_p12 = por %p702_p9, %p701_p3 }
 0x14a   : > { %p699_p2 = pneg %p698_p1 }
 0x14b   : > { %p705_p6 = por %p704_p8, %p703_p12 }
 0x14d   : > { %p706_p13 = pnand %p705_p6, %p699_p2 }
 0x14f   : > { %709 = shalt.err (!%p706_p13)
}
 0x150   : > { %552 = dma.vmem_to_hbm [thread:$0]  (%p1135_p0), %s1064_s27, 256, %s1062_s8, %s410_s23  }
 0x151 PF: > { %p563_p4 = scmp.ge.s32.totalorder %s780_s16, 2  ;;  %s438_s12 = sand.u32 1, %s752_s9  }
 0x152   : > { %p1136_p5 = scmp.ne.s32.totalorder %s1123_s28, 0  ;;  %s439_s13 = scalar_lea.sflag [#allocation4], %s438_s12 }
 0x154   : > { %p559_p7 = pnand %p563_p4, %p1136_p5 }
 0x156   : > { %747 = dma.done.wait (!%p559_p7), %s439_s13, 256  }
 0x157   : > { %749 = vsyncadd (!%p559_p7), %s439_s13, 4294967040  ;;  %s18_s16 = sadd.s32 1, %s780_s16   ;;  %s1137_s9 = smov %s756_s10 }
 0x158   : > { %p15_p10 = scmp.ge.s32.totalorder %s18_s16, 6   ;;  %s1138_s10 = smov %s760_s11 }
 0x159   : > { %s1139_s11 = smov %s891_s30  ;;  %s1140_s12 = smov %s772_s14 }
 0x15a   : > { %s1141_s13 = smov %s776_s15  ;;  %s1142_s14 = smov %s1145_s19 }
 0x15b   : > { %s1143_s15 = smov %s1149_s20  ;;  %17 = sbr.rel (!%p15_p10) target bundleno = 7 (0x7), region = 76 }
 0x162   :  { %444 = vsyncpa [#allocation3], 1 }
 0x163   :  { %446 = vsyncpa [#allocation3 + $0x1], 1 }
 0x164   :  { %447 = vsyncpa [#allocation4], 1 }
 0x165   :  { %449 = vsyncpa [#allocation4 + $0x1], 1 }

</bundles_post_ra>
